<compile_context>
chip_gen: v7x
topology: tpu7x:2x2x1
jax: 0.10.0
libtpu: 0.0.40
codegen_flags: <defaults>
</compile_context>

<pallas_src>
import math
from functools import partial

import jax
import jax.numpy as jnp
from jax import lax
from jax.experimental import pallas as pl
from jax.experimental.pallas import tpu as pltpu


def _pos_embedding_kernel(inv_freq_ref, cos_flag_ref, out_ref, *, tile_l):
    # inv_freq_ref / cos_flag_ref: (1, d_model); out_ref: (1, tile_l, d_model)
    i = pl.program_id(0)
    d_model = out_ref.shape[-1]

    # Row index within this tile -> absolute position.
    row = lax.broadcasted_iota(jnp.int32, (tile_l, d_model), 0)
    pos = (row + i * tile_l).astype(jnp.float32)                      # (tile_l, d_model)

    angle = pos * inv_freq_ref[...]                                   # broadcast (1,d)->(tl,d)
    pe = jnp.where(cos_flag_ref[...] > 0.5, jnp.cos(angle), jnp.sin(angle))
    out_ref[0] = pe


def positional_embedding(x, d_model, max_len=5000):
    """x: (B, L, ...) -- only x.shape[1] is used. Returns (1, L, d_model) float32."""
    L = x.shape[1]
    assert L <= max_len, "sequence length exceeds max_len"
    assert d_model % 2 == 0, "d_model must be even (matches the PyTorch module)"

    # Hoisted per-column constants (computed once by XLA outside the kernel).
    col = jnp.arange(d_model, dtype=jnp.int32)
    inv_freq = jnp.exp(
        (2 * (col // 2)).astype(jnp.float32) * (-math.log(10000.0) / d_model)
    ).reshape(1, d_model)
    cos_flag = (col % 2).astype(jnp.float32).reshape(1, d_model)      # 1.0 -> cos column

    # Tile the L axis: bounds VMEM per step and gives the megacore parallel grid points.
    tile_l = L if L <= 128 else 128
    grid = (pl.cdiv(L, tile_l),)

    out = pl.pallas_call(
        partial(_pos_embedding_kernel, tile_l=tile_l),
        grid=grid,
        in_specs=[
            pl.BlockSpec((1, d_model), lambda i: (0, 0)),
            pl.BlockSpec((1, d_model), lambda i: (0, 0)),
        ],
        out_specs=pl.BlockSpec((1, tile_l, d_model), lambda i: (0, i, 0)),
        out_shape=jax.ShapeDtypeStruct((1, L, d_model), jnp.float32),
        compiler_params=pltpu.CompilerParams(
            dimension_semantics=("parallel",),
        ),
    )(inv_freq, cos_flag)
    return out


def _reference(x, d_model, max_len=5000):
    """Pure-JAX transcription of the PyTorch buffer construction."""
    L = x.shape[1]
    position = jnp.arange(max_len, dtype=jnp.float32)[:, None]
    div_term = jnp.exp(
        jnp.arange(0, d_model, 2, dtype=jnp.float32) * (-math.log(10000.0) / d_model)
    )
    pe = jnp.zeros((max_len, d_model), jnp.float32)
    pe = pe.at[:, 0::2].set(jnp.sin(position * div_term))
    pe = pe.at[:, 1::2].set(jnp.cos(position * div_term))
    return pe[None, :L, :]


if __name__ == "__main__":
    B, L, d_model = 2, 8, 32

    key = jax.random.PRNGKey(0)
    x = jax.random.normal(key, (B, L, d_model), jnp.float32)

    out = positional_embedding(x, d_model)
    out = jax.block_until_ready(out)

    ref = _reference(x, d_model)
    assert out.shape == (1, L, d_model), out.shape
    assert jnp.allclose(out, ref, atol=1e-5, rtol=1e-5)

    print("KERNEL_OK")
</pallas_src>

<mosaic_0001>
module attributes {stable_mosaic.version = 11 : i64} {
  func.func @_pos_embedding_kernel(%arg0: i32, %arg1: memref<1x32xf32, #tpu.memory_space<vmem>>, %arg2: memref<1x32xf32, #tpu.memory_space<vmem>>, %arg3: memref<1x8x32xf32, #tpu.memory_space<vmem>>) attributes {dimension_semantics = [#tpu.dimension_semantics<parallel>], iteration_bounds = array<i64: 1>, scalar_prefetch = 0 : i64, scratch_operands = 0 : i64, tpu.core_type = #tpu.core_type<tc>, window_params = [{pipeline_mode = #tpu.pipeline_mode<synchronous>, transform_indices = @transform_0, window_bounds = array<i64: 1, 32>}, {pipeline_mode = #tpu.pipeline_mode<synchronous>, transform_indices = @transform_1, window_bounds = array<i64: 1, 32>}, {transform_indices = @transform_2, window_bounds = array<i64: 1, 8, 32>}]} {
    %0 = tpu.iota {dimensions = array<i32: 0>} : vector<8x32xi32>
    %c8_i32 = arith.constant 8 : i32
    %1 = arith.muli %arg0, %c8_i32 : i32
    %2 = vector.broadcast %1 : i32 to vector<8x32xi32>
    %3 = arith.addi %0, %2 : vector<8x32xi32>
    %4 = arith.sitofp %3 : vector<8x32xi32> to vector<8x32xf32>
    %c0 = arith.constant 0 : index
    %c0_0 = arith.constant 0 : index
    %5 = vector.load %arg1[%c0, %c0_0] : memref<1x32xf32, #tpu.memory_space<vmem>>, vector<1x32xf32>
    %6 = vector.broadcast %5 : vector<1x32xf32> to vector<8x32xf32>
    %7 = arith.mulf %4, %6 : vector<8x32xf32>
    %c0_1 = arith.constant 0 : index
    %c0_2 = arith.constant 0 : index
    %8 = vector.load %arg2[%c0_1, %c0_2] : memref<1x32xf32, #tpu.memory_space<vmem>>, vector<1x32xf32>
    %cst = arith.constant 5.000000e-01 : f32
    %9 = vector.broadcast %cst : f32 to vector<1x32xf32>
    %10 = arith.cmpf ogt, %8, %9 : vector<1x32xf32>
    %11 = math.cos %7 : vector<8x32xf32>
    %12 = math.sin %7 : vector<8x32xf32>
    %13 = vector.shape_cast %10 : vector<1x32xi1> to vector<1x32xi1>
    %14 = vector.broadcast %13 : vector<1x32xi1> to vector<8x32xi1>
    %15 = arith.select %14, %11, %12 : vector<8x32xi1>, vector<8x32xf32>
    %c0_3 = arith.constant 0 : index
    %c0_4 = arith.constant 0 : index
    %c0_5 = arith.constant 0 : index
    %16 = vector.load %arg3[%c0_3, %c0_4, %c0_5] : memref<1x8x32xf32, #tpu.memory_space<vmem>>, vector<1x8x32xf32>
    %17 = vector.shape_cast %16 : vector<1x8x32xf32> to vector<8x32xf32>
    %18 = vector.shape_cast %15 : vector<8x32xf32> to vector<1x8x32xf32>
    tpu.vector_store %arg3[%c0_3, %c0_4, %c0_5], %18 {strides = array<i32>} : memref<1x8x32xf32, #tpu.memory_space<vmem>>, vector<1x8x32xf32>,
    return
  }
  func.func @transform_0(%arg0: i32) -> (i32, i32) {
    %c0_i32 = arith.constant 0 : i32
    %c0_i32_0 = arith.constant 0 : i32
    %c0_i32_1 = arith.constant 0 : i32
    return %c0_i32, %c0_i32_0 : i32, i32
  }
  func.func @transform_1(%arg0: i32) -> (i32, i32) {
    %c0_i32 = arith.constant 0 : i32
    %c0_i32_0 = arith.constant 0 : i32
    %c0_i32_1 = arith.constant 0 : i32
    return %c0_i32, %c0_i32_0 : i32, i32
  }
  func.func @transform_2(%arg0: i32) -> (i32, i32, i32) {
    %c0_i32 = arith.constant 0 : i32
    %c0_i32_0 = arith.constant 0 : i32
    %c0_i32_1 = arith.constant 0 : i32
    return %c0_i32, %arg0, %c0_i32_0 : i32, i32, i32
  }
}

</mosaic_0001>

<bundles_post_ra>
// kernel: tpu_custom_call.1
= control target key start
LH: loop header
LB: loop body
LE: loop exit
PB: predicated region body
PF: predicated region fallthrough
CT: control target
= control target key end

     0   :  { %7 = vsyncpa [#allocation3], 0  ;;  %s421_s0 = inlined_call_operand.hbm [shape: f32[1,32], index: 0, kind: input, shape index: {}]   ;;  %s422_s1 = inlined_call_operand.vmem [shape: f32[1,32], index: 1, kind: input, shape index: {}]   ;;  %s423_s2 = inlined_call_operand.hbm [shape: f32[1,8,32], index: 2, kind: output, shape index: {}]  }
   0x1   :  { %8 = vsyncpa [#allocation4], 0  ;;  %s345_s9 = smov [#allocation2]   ;;  %s297_s13 = scalar_lea.hbm %s421_s0, 16 }
   0x2   :  { %s15_s10 = sshll.u32 %s345_s9, 4  ;;  %p298_p0 = scmp.ne.s32.totalorder %s421_s0, %s297_s13  ;;  %s16_s10 = int_to_ptr.vmem [resolvable:$true] %s15_s10 }
   0x3   :  { %p301_p1 = scmp.lt.u32.totalorder %s297_s13, %s421_s0 }
   0x5   :  { %p303_p2 = pnand %p301_p1, %p298_p0 }
   0x7   :  { %306 = shalt.err (!%p303_p2)
}
   0x8   :  { %s307_s18 = scalar_lea.vmem %s16_s10, 16  ;;  %s311_s19 = scalar_lea.vmem %s16_s10, 32 }
   0x9   :  { %p308_p3 = scmp.ne.s32.totalorder %s16_s10, %s307_s18  ;;  %p312_p4 = scmp.lt.s32.totalorder %s16_s10, %s16_s10 }
   0xa   :  { %p313_p5 = scmp.lt.s32.totalorder %s311_s19, %s307_s18 }
   0xc   :  { %p314_p6 = por %p313_p5, %p312_p4 }
   0xe   :  { %p315_p7 = pnand %p314_p6, %p308_p3 }
  0x10   :  { %318 = shalt.err (!%p315_p7)
}
  0x11   :  { %18 = dma.hbm_to_vmem [thread:$0]  %s421_s0, 16, %s16_s10, [#allocation3]  }
  0x12   :  { %341 = dma.done.wait [#allocation3], 16  }
  0x13   :  { %342 = vsyncadd [#allocation3], 4294967280  ;;  %v24_v0 = vlaneseq  ;;  %v271_v3 = vld [vmem:[#allocation2] ss:$0 sm:$0xff]  ;;  %v346_v16 = vmov 683565275  }
  0x14   :  { %v347_v18 = vmov 2475754826   ;;  %v348_v20 = vmov 2131351028   ;;  %v349_v22 = vmov 2102212464  }
  0x15   :  { %v381_v1 = vshrl.u32 %v24_v0, 7  ;;  %v350_v24 = vmov 920167782   ;;  %v351_v31 = vmov 1326507024  }
  0x17   :  { %v29_v2 = vcvt.s32.f32 %v381_v1 }
  0x19   :  { %v384_v4 = vmul.f32 %v271_v3, %v29_v2 }
  0x1b   :  { %v43_v5 = vand.u32 2139095040, %v384_v4  ;;  %v40_v7 = vand.u32 2147483647, %v384_v4  ;;  %vm42_vm7 = vcmp.lt.s32.totalorder %v384_v4, 0 }
  0x1d   :  { %v44_v6 = vshrl.u32 %v43_v5, 23  ;;  %v47_v10 = vand.u32 8388607, %v40_v7  ;;  %vm41_vm8 = vcmp.le.f32.partialorder %v40_v7, 0.7853982 }
  0x1f   :  { %v272_v8 = vadd.s32 4294967169, %v44_v6  ;;  %v48_v13 = vor.u32 8388608, %v47_v10 }
  0x21   :  { %v50_v9 = vadd.s32 1, %v272_v8  ;;  %v88_v33 = vshll.u32 %v48_v13, 8 }
  0x23   :  { %vm51_vm0 = vcmp.gt.s32.totalorder %v50_v9, 0 }
  0x24   :  { %v52_v11 = vsel %vm51_vm0, %v50_v9, 0  ;;  %vm132_vm0 = vweird.f32 %v384_v4 }
  0x25   :  { %v54_v12 = vand.u32 31, %v52_v11  ;;  %v53_v14 = vshrl.u32 %v52_v11, 5 }
  0x27   :  { %v55_v15 = vsub.s32 32, %v54_v12  ;;  %v57_v17 = vshll.u32 %v346_v16, %v54_v12  ;;  %v60_v19 = vshll.u32 %v347_v18, %v54_v12  ;;  %v63_v21 = vshll.u32 %v348_v20, %v54_v12 }
  0x28   :  { %v66_v23 = vshll.u32 %v349_v22, %v54_v12  ;;  %v69_v25 = vshll.u32 %v350_v24, %v54_v12  ;;  %vm72_vm1 = vcmp.lt.s32.totalorder %v53_v14, 1  ;;  %vm75_vm2 = vcmp.lt.s32.totalorder %v53_v14, 4 }
  0x29   :  { %v56_v26 = vshrl.u32 %v346_v16, %v55_v15  ;;  %v58_v27 = vshrl.u32 %v347_v18, %v55_v15  ;;  %v61_v28 = vshrl.u32 %v348_v20, %v55_v15  ;;  %v64_v29 = vshrl.u32 %v349_v22, %v55_v15 }
  0x2a   :  { %v67_v30 = vshrl.u32 %v350_v24, %v55_v15  ;;  %v70_v32 = vshrl.u32 %v351_v31, %v55_v15  ;;  %vm73_vm3 = vcmp.lt.s32.totalorder %v53_v14, 2  ;;  %vm74_vm4 = vcmp.lt.s32.totalorder %v53_v14, 3 }
  0x2b   :  { %v59_v34 = vor.u32 %v58_v27, %v57_v17  ;;  %v62_v35 = vor.u32 %v61_v28, %v60_v19  ;;  %v65_v36 = vor.u32 %v64_v29, %v63_v21  ;;  %v250_v29 = vsub.s32 0, %v381_v1 }
  0x2c   :  { %v68_v37 = vor.u32 %v67_v30, %v66_v23  ;;  %v71_v38 = vor.u32 %v70_v32, %v69_v25  ;;  %v38_v25 = vld [vmem:[%s422_s1] sm:$0x1]  ;;  %v352_v30 = vmov 0   ;;  %s353_s1 = smov [#allocation5]  }
  0x2d   :  { %v76_v39 = vsel %vm72_vm1, %v56_v26, %v59_v34  ;;  %v77_v40 = vsel %vm75_vm2, %v65_v36, 2102212464  ;;  %v80_v41 = vsel %vm72_vm1, %v59_v34, %v62_v35  ;;  %v84_v42 = vsel %vm72_vm1, %v62_v35, %v65_v36  ;;  %s262_s23 = sshll.u32 %s353_s1, 4  ;;  %s263_s23 = int_to_ptr.vmem [resolvable:$true] %s262_s23 }
  0x2e   :  { %v78_v43 = vsel %vm74_vm4, %v62_v35, %v77_v40  ;;  %v81_v44 = vsel %vm75_vm2, %v68_v37, 920167782  ;;  %v85_v45 = vsel %vm75_vm2, %v71_v38, 1326507024  ;;  %vm39_vm9 = vcmp.gt.f32.partialorder %v38_v25, 0.5  ;;  %s319_s24 = scalar_lea.vmem %s263_s23, 128  ;;  %p324_p9 = scmp.lt.s32.totalorder %s263_s23, %s263_s23 }
  0x2f   :  { %v82_v46 = vsel %vm74_vm4, %v65_v36, %v81_v44  ;;  %v86_v47 = vsel %vm74_vm4, %v68_v37, %v85_v45  ;;  %v79_v48 = vsel %vm73_vm3, %v76_v39, %v78_v43  ;;  %v247_v7 = vsel %vm39_vm9, 1, %v352_v30  ;;  %p320_p8 = scmp.ne.s32.totalorder %s263_s23, %s319_s24  ;;  %p325_p10 = scmp.lt.s32.totalorder %s319_s24, %s319_s24 }
  0x30   :  { %v83_v49 = vsel %vm73_vm3, %v80_v41, %v82_v46  ;;  %v87_v50 = vsel %vm73_vm3, %v84_v42, %v86_v47  ;;  %v95_v55 = vmul.u32 %v88_v33, %v79_v48  ;;  %v251_v32 = vrot.slane %v247_v7, %v250_v29 }
  0x31   :  { %v390_v51 = vmul.u32.u64.low %v88_v33, %v87_v50  ;;  %v391_v52 = vmul.u32.u64.high %v88_v33, %v87_v50, %v390_v51  ;;  %v393_v53 = vmul.u32.u64.low %v88_v33, %v83_v49  ;;  %v394_v54 = vmul.u32.u64.high %v88_v33, %v83_v49, %v393_v53  ;;  %p326_p11 = por %p325_p10, %p324_p9 }
  0x32   :  { %vm252_vm1 = vcmp.eq.s32.totalorder %v251_v32, 1  ;;  %vm254_vm2 = vcmask 261120  }
  0x33   :  { %vm97_vm5 = vc.u32 %v391_v52, %v393_v53  ;;  %v98_v56 = vadd.s32 1, %v394_v54  ;;  %v96_v5 = vadd.s32 %v393_v53, %v391_v52  ;;  %p327_p12 = pnand %p326_p11, %p320_p8 }
  0x35   :  { %v99_v57 = vsel %vm97_vm5, %v98_v56, %v394_v54 }
  0x36   :  { %v100_v58 = vadd.s32 %v99_v57, %v95_v55 }
  0x38   :  { %v101_v59 = vadd.s32 536870912, %v100_v58 }
  0x3a   :  { %v102_v60 = vshrl.u32 %v101_v59, 30 }
  0x3c   :  { %v103_v61 = vshll.u32 %v102_v60, 30  ;;  %v126_v18 = vsub.s32 4, %v102_v60 }
  0x3e   :  { %v104_v62 = vsub.s32 %v100_v58, %v103_v61  ;;  %v127_v21 = vsel %vm42_vm7, %v126_v18, %v102_v60 }
  0x3f   :  { %v129_v24 = vsel %vm41_vm8, 0, %v127_v21 }
  0x40   :  { %v106_v63 = vsub.s32 0, %v104_v62  ;;  %v236_v26 = vadd.s32 3, %v129_v24  ;;  %v133_v27 = vand.u32 3, %v129_v24 }
  0x42   :  { %v273_v0 = vmin.u32 %v106_v63, %v104_v62  ;;  %v237_v28 = vand.u32 3, %v236_v26  ;;  %vm138_vm10 = vcmp.eq.s32.totalorder %v133_v27, 2  ;;  %vm135_vm12 = vcmp.eq.s32.totalorder %v133_v27, 0 }
  0x43   :  { %vm134_vm14 = vcmp.lt.s32.totalorder %v133_v27, 2 }
  0x44   :  { %v108_v2 = vclz %v273_v0  ;;  %vm242_vm11 = vcmp.eq.s32.totalorder %v237_v28, 2  ;;  %vm239_vm13 = vcmp.eq.s32.totalorder %v237_v28, 0  ;;  %vm238_vm15 = vcmp.lt.s32.totalorder %v237_v28, 2 }
  0x46   :  { %v274_v3 = vadd.s32 4294967294, %v108_v2 }
  0x48   :  { %vm275_vm6 = vcmp.lt.s32.totalorder %v274_v3, 0 }
  0x49   :  { %v111_v6 = vsel %vm275_vm6, 0, %v274_v3 }
  0x4a   :  { %v112_v8 = vsub.s32 32, %v111_v6  ;;  %v113_v9 = vshll.u32 %v104_v62, %v111_v6  ;;  %v116_v10 = vsub.s32 4294967266, %v111_v6 }
  0x4c   :  { %v114_v11 = vshrl.u32 %v96_v5, %v112_v8  ;;  %v117_v12 = vadd.s32 127, %v116_v10 }
  0x4e   :  { %v115_v13 = vor.u32 %v114_v11, %v113_v9  ;;  %v118_v14 = vshll.u32 %v117_v12, 23 }
  0x50   :  { %v119_v15 = vor.u32 4788187, %v118_v14  ;;  %v122_v16 = vcvt.s32.f32 %v115_v13 }
  0x52   :  { %v120_v17 = vand.u32 2147483647, %v119_v15 }
  0x54   :  { %v123_v19 = vmul.f32 %v122_v16, %v120_v17 }
  0x56   :  { %v124_v20 = vxor.u32 2147483648, %v123_v19 }
  0x58   :  { %v125_v22 = vsel %vm42_vm7, %v124_v20, %v123_v19 }
  0x59   :  { %v128_v23 = vsel %vm41_vm8, %v384_v4, %v125_v22 }
  0x5a   :  { %293 = vcosq.f32 %v128_v23 }
  0x5b   :  { %295 = vsinq.f32 %v128_v23 }
  0x64   :  { %v294_v31 = vpop.eup %293 }
  0x65   :  { %v296_v33 = vpop.eup %295  ;;  %v139_v34 = vxor.u32 2147483648, %v294_v31 }
  0x66   :  { %v136_v35 = vxor.u32 2147483648, %v296_v33 }
  0x67   :  { %v140_v36 = vsel %vm138_vm10, %v139_v34, %v296_v33  ;;  %v244_v37 = vsel %vm242_vm11, %v139_v34, %v296_v33 }
  0x68   :  { %v137_v1 = vsel %vm135_vm12, %v294_v31, %v136_v35  ;;  %v241_v38 = vsel %vm239_vm13, %v294_v31, %v136_v35 }
  0x69   :  { %v141_v39 = vsel %vm134_vm14, %v137_v1, %v140_v36  ;;  %v245_v40 = vsel %vm238_vm15, %v241_v38, %v244_v37 }
  0x6a   :  { %v142_v41 = vsel %vm132_vm0, nan, %v141_v39  ;;  %v246_v42 = vsel %vm132_vm0, nan, %v245_v40 }
  0x6b   :  { %v253_v43 = vsel %vm252_vm1, %v142_v41, %v246_v42 }
  0x6c   :  { %255 = vst.msk [vmem:[#allocation5] sm:$0xff] %vm254_vm2, %v253_v43 }
  0x6d   :  { %330 = shalt.err (!%p327_p12)
}
  0x6e   :  { %s331_s27 = scalar_lea.hbm %s423_s2, 128 }
  0x6f   :  { %p332_p13 = scmp.ne.s32.totalorder %s423_s2, %s331_s27  ;;  %p335_p0 = scmp.lt.u32.totalorder %s331_s27, %s423_s2 }
  0x71   :  { %p337_p1 = pnand %p335_p0, %p332_p13 }
  0x73   :  { %340 = shalt.err (!%p337_p1)
}
  0x74   :  { %265 = dma.vmem_to_hbm [thread:$0]  %s263_s23, 128, %s423_s2, [#allocation4]  }
  0x75   :  { %343 = dma.done.wait [#allocation4], 128  }
  0x76   :  { %344 = vsyncadd [#allocation4], 4294967168 }
  0x77   :  { %269 = vsyncpa [#allocation3], 1 }
  0x78   :  { %270 = vsyncpa [#allocation4], 1 }

</bundles_post_ra>
